<compile_context>
chip_gen: v6e
topology: v6e:2x2x1
jax: 0.10.0
libtpu: 0.0.40
codegen_flags: <defaults>
</compile_context>

<pallas_src>
import functools
import math

import jax
import jax.numpy as jnp
from jax import lax
from jax.experimental import pallas as pl
from jax.experimental.pallas import tpu as pltpu

LOG_SIG_MAX = 2.0
LOG_SIG_MIN = -20.0
EPSILON = 1e-6
# action_space=None in the reference module:
ACTION_SCALE = 1.0
ACTION_BIAS = 0.0
_LOG_SQRT_2PI = 0.5 * math.log(2.0 * math.pi)

_LANE = 128


def _round_up(x, m):
    return ((x + m - 1) // m) * m


def _gaussian_policy_kernel(state_ref, noise_ref,
                            w1_ref, b1_ref,
                            w2_ref, b2_ref,
                            wh_ref, bh_ref,
                            out_ref, *, num_actions, a_pad):
    A = num_actions
    AP = a_pad

    # ---- MLP trunk: 2x (linear + relu).  bf16 MXU operands, f32 accumulate.
    x = state_ref[...].astype(jnp.bfloat16)
    h1 = jnp.dot(x, w1_ref[...], preferred_element_type=jnp.float32) + b1_ref[...]
    h1 = jnp.maximum(h1, 0.0)

    h2 = jnp.dot(h1.astype(jnp.bfloat16), w2_ref[...],
                 preferred_element_type=jnp.float32) + b2_ref[...]
    h2 = jnp.maximum(h2, 0.0)

    # ---- Fused heads: [mean | log_std], each half lane-padded to AP (mult.
    #      of 128), so both slices below are tile-aligned and free.
    heads = jnp.dot(h2.astype(jnp.bfloat16), wh_ref[...],
                    preferred_element_type=jnp.float32) + bh_ref[...]
    mean = heads[:, :AP]
    log_std = jnp.clip(heads[:, AP:], LOG_SIG_MIN, LOG_SIG_MAX)
    std = jnp.exp(log_std)

    # ---- Reparameterized sample + tanh squash (full 128-lane-wide vregs;
    #      padded lanes carry zeros from the zero-padded weights/noise).
    eps = noise_ref[...]                      # eps ~ N(0, 1), lane-padded
    x_t = mean + std * eps
    y_t = jnp.tanh(x_t)
    action = y_t * ACTION_SCALE + ACTION_BIAS

    # ---- Normal(mean, std).log_prob(x_t): (x_t - mean)/std == eps exactly,
    #      so no divide is needed.
    log_prob = -0.5 * (eps * eps) - log_std - _LOG_SQRT_2PI
    # tanh-squash correction (kept identical to the PyTorch reference).
    log_prob = log_prob - jnp.log(ACTION_SCALE * (1.0 - y_t * y_t) + EPSILON)
    # Mask out the padded lanes before the per-row sum.
    lane_id = lax.broadcasted_iota(jnp.int32, log_prob.shape, 1)
    log_prob = jnp.where(lane_id < A, log_prob, 0.0)
    log_prob_sum = jnp.sum(log_prob, axis=1, keepdims=True)

    mean_sq = jnp.tanh(mean) * ACTION_SCALE + ACTION_BIAS

    # ---- Pack [action | tanh(mean) | log_prob] into one lane-dense slab and
    #      do a single unmasked store (all chunks are 128-lane aligned).
    lp_block = jnp.broadcast_to(log_prob_sum, (log_prob_sum.shape[0], _LANE))
    out_ref[...] = jnp.concatenate([action, mean_sq, lp_block], axis=1)


def _vmem_bytes_estimate(tb, num_inputs, hidden, a_pad, out_w):
    """Rough upper bound on the kernel's VMEM footprint for one grid step."""
    f32, bf16 = 4, 2
    # Grid-resident weights/biases; budget for the pipeliner's two buffers.
    weights = 2 * ((num_inputs * hidden + hidden * hidden + hidden * 2 * a_pad) * bf16
                   + (2 * hidden + 2 * a_pad) * f32)
    # Double-buffered streamed tiles (state/noise in, packed slab out).
    streamed = 2 * tb * (num_inputs + a_pad + out_w) * f32
    # Live intermediates: h1/h2 in f32 + bf16 copies, heads + ~8 AP-wide temps.
    inter = tb * (2 * hidden * (f32 + bf16) + 10 * a_pad * f32)
    return weights + streamed + inter


def gaussian_policy_forward(state, noise, params, *, tile_b=None):
    """Returns (action, log_prob, mean) like GaussianPolicy.forward."""
    B, num_inputs = state.shape
    A = noise.shape[1]                         # true number of actions
    hidden = params["w1"].shape[1]
    AP = params["wh"].shape[1] // 2            # lane-padded action width
    out_w = 2 * AP + _LANE                     # [action | mean | log_prob] slab

    # Lane-pad the noise so the kernel works on aligned 128-wide blocks.
    if noise.shape[1] != AP:
        noise = jnp.pad(noise, ((0, 0), (0, AP - noise.shape[1])))

    # ---- Batch tiling.
    if tile_b is None:
        tile_b = 256 if hidden >= 2048 else 1024   # big tiles amortize grid overhead
    n_tiles = max(pl.cdiv(B, tile_b), 1)
    if n_tiles < 2 and B > 8:
        n_tiles = 2          # v7x: >=2 grid steps so both TensorCores get work
    tb = min(_round_up(pl.cdiv(B, n_tiles), 8), _round_up(B, 8))  # balanced tiles

    # ---- Shape-derived VMEM budget, clamped to the chip's physical VMEM.
    try:
        info = pltpu.get_tpu_info()
        vmem_cap = getattr(info, "vmem_capacity_bytes", 64 * 1024 * 1024)
    except Exception:                                   # pragma: no cover
        vmem_cap = 64 * 1024 * 1024                     # v7x floor
    budget = int(0.75 * vmem_cap)
    while tb > 8 and _vmem_bytes_estimate(tb, num_inputs, hidden, AP, out_w) > budget:
        tb = max(8, _round_up(tb // 2, 8))
    est = _vmem_bytes_estimate(tb, num_inputs, hidden, AP, out_w)
    vmem_limit = min(max(int(1.5 * est), 32 * 1024 * 1024), budget)

    grid = (pl.cdiv(B, tb),)

    def row_spec(cols):
        return pl.BlockSpec((tb, cols), lambda i: (i, 0))

    def full_spec(shape):
        # Constant index_map -> weights stay resident; the pipeliner only
        # re-DMAs a block when its index changes (never here).
        return pl.BlockSpec(shape, lambda i: (0, 0))

    out = pl.pallas_call(
        functools.partial(_gaussian_policy_kernel, num_actions=A, a_pad=AP),
        grid=grid,
        out_shape=jax.ShapeDtypeStruct((B, out_w), jnp.float32),
        in_specs=[
            row_spec(num_inputs),             # state
            row_spec(AP),                     # noise (lane-padded)
            full_spec(params["w1"].shape), full_spec(params["b1"].shape),
            full_spec(params["w2"].shape), full_spec(params["b2"].shape),
            full_spec(params["wh"].shape), full_spec(params["bh"].shape),
        ],
        out_specs=row_spec(out_w),
        compiler_params=pltpu.CompilerParams(
            dimension_semantics=("parallel",),
            vmem_limit_bytes=vmem_limit,
        ),
    )(state, noise,
      params["w1"], params["b1"],
      params["w2"], params["b2"],
      params["wh"], params["bh"])

    # Static slices outside the kernel are cheap.
    action = out[:, :A]
    mean = out[:, AP:AP + A]
    log_prob = out[:, 2 * AP:2 * AP + 1]
    return action, log_prob, mean


def xavier_uniform(key, fan_in, fan_out):
    # gain = 1, matches torch.nn.init.xavier_uniform_; stored as (in, out).
    bound = math.sqrt(6.0 / (fan_in + fan_out))
    return jax.random.uniform(key, (fan_in, fan_out), jnp.float32, -bound, bound)


def init_params(key, num_inputs, num_actions, hidden_dim):
    k1, k2, k3, k4 = jax.random.split(key, 4)
    AP = _round_up(max(num_actions, 1), _LANE)
    wm = xavier_uniform(k3, hidden_dim, num_actions)
    wl = xavier_uniform(k4, hidden_dim, num_actions)

    def pad_head(w):
        return jnp.pad(w, ((0, 0), (0, AP - num_actions)))

    return {
        # Matmul operands in bf16 (f32 accumulation inside the kernel);
        # biases stay f32 and are added post-matmul.
        "w1": xavier_uniform(k1, num_inputs, hidden_dim).astype(jnp.bfloat16),
        "b1": jnp.zeros((1, hidden_dim), jnp.float32),
        "w2": xavier_uniform(k2, hidden_dim, hidden_dim).astype(jnp.bfloat16),
        "b2": jnp.zeros((1, hidden_dim), jnp.float32),
        # Fused head weights/bias: [mean | 0-pad | log_std | 0-pad], each half
        # lane-padded to a multiple of 128 so the in-kernel split is aligned.
        "wh": jnp.concatenate([pad_head(wm), pad_head(wl)], axis=1).astype(jnp.bfloat16),
        "bh": jnp.zeros((1, 2 * AP), jnp.float32),
    }


if __name__ == "__main__":
    batch = 8
    num_inputs = 16
    num_actions = 8
    hidden_dim = 32

    root = jax.random.PRNGKey(0)
    k_params, k_state, k_noise = jax.random.split(root, 3)

    params = init_params(k_params, num_inputs, num_actions, hidden_dim)
    state = jax.random.normal(k_state, (batch, num_inputs), jnp.float32)
    noise = jax.random.normal(k_noise, (batch, num_actions), jnp.float32)

    action, log_prob, mean = gaussian_policy_forward(state, noise, params)
    jax.block_until_ready((action, log_prob, mean))

    assert action.shape == (batch, num_actions)
    assert log_prob.shape == (batch, 1)
    assert mean.shape == (batch, num_actions)
    assert bool(jnp.all(jnp.isfinite(action)))
    assert bool(jnp.all(jnp.isfinite(log_prob)))
    assert bool(jnp.all(jnp.isfinite(mean)))
    assert bool(jnp.all(jnp.abs(action) <= 1.0))
    assert bool(jnp.all(jnp.abs(mean) <= 1.0))

    print("KERNEL_OK")
</pallas_src>

<mosaic_0001>
module attributes {stable_mosaic.version = 11 : i64} {
  func.func @_gaussian_policy_kernel(%arg0: i32, %arg1: memref<8x16xf32, #tpu.memory_space<vmem>>, %arg2: memref<8x128xf32, #tpu.memory_space<vmem>>, %arg3: memref<16x32xbf16, #tpu.memory_space<vmem>>, %arg4: memref<1x32xf32, #tpu.memory_space<vmem>>, %arg5: memref<32x32xbf16, #tpu.memory_space<vmem>>, %arg6: memref<1x32xf32, #tpu.memory_space<vmem>>, %arg7: memref<32x256xbf16, #tpu.memory_space<vmem>>, %arg8: memref<1x256xf32, #tpu.memory_space<vmem>>, %arg9: memref<8x384xf32, #tpu.memory_space<vmem>>) attributes {dimension_semantics = [#tpu.dimension_semantics<parallel>], iteration_bounds = array<i64: 1>, scalar_prefetch = 0 : i64, scratch_operands = 0 : i64, tpu.core_type = #tpu.core_type<tc>, window_params = [{transform_indices = @transform_0, window_bounds = array<i64: 8, 16>}, {transform_indices = @transform_1, window_bounds = array<i64: 8, 128>}, {pipeline_mode = #tpu.pipeline_mode<synchronous>, transform_indices = @transform_2, window_bounds = array<i64: 16, 32>}, {pipeline_mode = #tpu.pipeline_mode<synchronous>, transform_indices = @transform_3, window_bounds = array<i64: 1, 32>}, {pipeline_mode = #tpu.pipeline_mode<synchronous>, transform_indices = @transform_4, window_bounds = array<i64: 32, 32>}, {pipeline_mode = #tpu.pipeline_mode<synchronous>, transform_indices = @transform_5, window_bounds = array<i64: 1, 32>}, {pipeline_mode = #tpu.pipeline_mode<synchronous>, transform_indices = @transform_6, window_bounds = array<i64: 32, 256>}, {pipeline_mode = #tpu.pipeline_mode<synchronous>, transform_indices = @transform_7, window_bounds = array<i64: 1, 256>}, {transform_indices = @transform_8, window_bounds = array<i64: 8, 384>}]} {
    %c0 = arith.constant 0 : index
    %c0_0 = arith.constant 0 : index
    %0 = vector.load %arg1[%c0, %c0_0] : memref<8x16xf32, #tpu.memory_space<vmem>>, vector<8x16xf32>
    %1 = arith.truncf %0 : vector<8x16xf32> to vector<8x16xbf16>
    %c0_1 = arith.constant 0 : index
    %c0_2 = arith.constant 0 : index
    %2 = vector.load %arg3[%c0_1, %c0_2] : memref<16x32xbf16, #tpu.memory_space<vmem>>, vector<16x32xbf16>
    %cst = arith.constant dense<0.000000e+00> : vector<8x32xf32>
    %3 = tpu.matmul %1, %2, %cst {dimension_numbers = #tpu.dot_dimension_numbers<[1], [0], [0], [1], [0, 0, 1, 1], [], []>} : vector<8x16xbf16>, vector<16x32xbf16>, vector<8x32xf32> -> vector<8x32xf32>
    %c0_3 = arith.constant 0 : index
    %c0_4 = arith.constant 0 : index
    %4 = vector.load %arg4[%c0_3, %c0_4] : memref<1x32xf32, #tpu.memory_space<vmem>>, vector<1x32xf32>
    %5 = vector.broadcast %4 : vector<1x32xf32> to vector<8x32xf32>
    %6 = arith.addf %3, %5 : vector<8x32xf32>
    %cst_5 = arith.constant 0.000000e+00 : f32
    %7 = vector.broadcast %cst_5 : f32 to vector<8x32xf32>
    %8 = arith.maximumf %6, %7 : vector<8x32xf32>
    %9 = arith.truncf %8 : vector<8x32xf32> to vector<8x32xbf16>
    %c0_6 = arith.constant 0 : index
    %c0_7 = arith.constant 0 : index
    %10 = vector.load %arg5[%c0_6, %c0_7] : memref<32x32xbf16, #tpu.memory_space<vmem>>, vector<32x32xbf16>
    %cst_8 = arith.constant dense<0.000000e+00> : vector<8x32xf32>
    %11 = tpu.matmul %9, %10, %cst_8 {dimension_numbers = #tpu.dot_dimension_numbers<[1], [0], [0], [1], [0, 0, 1, 1], [], []>} : vector<8x32xbf16>, vector<32x32xbf16>, vector<8x32xf32> -> vector<8x32xf32>
    %c0_9 = arith.constant 0 : index
    %c0_10 = arith.constant 0 : index
    %12 = vector.load %arg6[%c0_9, %c0_10] : memref<1x32xf32, #tpu.memory_space<vmem>>, vector<1x32xf32>
    %13 = vector.broadcast %12 : vector<1x32xf32> to vector<8x32xf32>
    %14 = arith.addf %11, %13 : vector<8x32xf32>
    %cst_11 = arith.constant 0.000000e+00 : f32
    %15 = vector.broadcast %cst_11 : f32 to vector<8x32xf32>
    %16 = arith.maximumf %14, %15 : vector<8x32xf32>
    %17 = arith.truncf %16 : vector<8x32xf32> to vector<8x32xbf16>
    %c0_12 = arith.constant 0 : index
    %c0_13 = arith.constant 0 : index
    %18 = vector.load %arg7[%c0_12, %c0_13] : memref<32x256xbf16, #tpu.memory_space<vmem>>, vector<32x256xbf16>
    %cst_14 = arith.constant dense<0.000000e+00> : vector<8x256xf32>
    %19 = tpu.matmul %17, %18, %cst_14 {dimension_numbers = #tpu.dot_dimension_numbers<[1], [0], [0], [1], [0, 0, 1, 1], [], []>} : vector<8x32xbf16>, vector<32x256xbf16>, vector<8x256xf32> -> vector<8x256xf32>
    %c0_15 = arith.constant 0 : index
    %c0_16 = arith.constant 0 : index
    %20 = vector.load %arg8[%c0_15, %c0_16] : memref<1x256xf32, #tpu.memory_space<vmem>>, vector<1x256xf32>
    %21 = vector.broadcast %20 : vector<1x256xf32> to vector<8x256xf32>
    %22 = arith.addf %19, %21 : vector<8x256xf32>
    %23 = vector.extract_strided_slice %22 {offsets = [0, 0], sizes = [8, 128], strides = [1, 1]} : vector<8x256xf32> to vector<8x128xf32>
    %24 = vector.extract_strided_slice %22 {offsets = [0, 128], sizes = [8, 128], strides = [1, 1]} : vector<8x256xf32> to vector<8x128xf32>
    %cst_17 = arith.constant -2.000000e+01 : f32
    %cst_18 = arith.constant 2.000000e+00 : f32
    %25 = vector.broadcast %cst_17 : f32 to vector<8x128xf32>
    %26 = arith.maximumf %25, %24 : vector<8x128xf32>
    %27 = vector.broadcast %cst_18 : f32 to vector<8x128xf32>
    %28 = arith.minimumf %27, %26 : vector<8x128xf32>
    %29 = math.exp %28 : vector<8x128xf32>
    %c0_19 = arith.constant 0 : index
    %c0_20 = arith.constant 0 : index
    %30 = vector.load %arg2[%c0_19, %c0_20] : memref<8x128xf32, #tpu.memory_space<vmem>>, vector<8x128xf32>
    %31 = arith.mulf %29, %30 : vector<8x128xf32>
    %32 = arith.addf %23, %31 : vector<8x128xf32>
    %33 = math.tanh %32 : vector<8x128xf32>
    %cst_21 = arith.constant 1.000000e+00 : f32
    %34 = vector.broadcast %cst_21 : f32 to vector<8x128xf32>
    %35 = arith.mulf %33, %34 : vector<8x128xf32>
    %cst_22 = arith.constant 0.000000e+00 : f32
    %36 = vector.broadcast %cst_22 : f32 to vector<8x128xf32>
    %37 = arith.addf %35, %36 : vector<8x128xf32>
    %38 = arith.mulf %30, %30 : vector<8x128xf32>
    %cst_23 = arith.constant -5.000000e-01 : f32
    %39 = vector.broadcast %cst_23 : f32 to vector<8x128xf32>
    %40 = arith.mulf %39, %38 : vector<8x128xf32>
    %41 = arith.subf %40, %28 : vector<8x128xf32>
    %cst_24 = arith.constant 0.918938517 : f32
    %42 = vector.broadcast %cst_24 : f32 to vector<8x128xf32>
    %43 = arith.subf %41, %42 : vector<8x128xf32>
    %44 = arith.mulf %33, %33 : vector<8x128xf32>
    %cst_25 = arith.constant 1.000000e+00 : f32
    %45 = vector.broadcast %cst_25 : f32 to vector<8x128xf32>
    %46 = arith.subf %45, %44 : vector<8x128xf32>
    %cst_26 = arith.constant 1.000000e+00 : f32
    %47 = vector.broadcast %cst_26 : f32 to vector<8x128xf32>
    %48 = arith.mulf %47, %46 : vector<8x128xf32>
    %cst_27 = arith.constant 9.99999997E-7 : f32
    %49 = vector.broadcast %cst_27 : f32 to vector<8x128xf32>
    %50 = arith.addf %48, %49 : vector<8x128xf32>
    %51 = math.log %50 : vector<8x128xf32>
    %52 = arith.subf %43, %51 : vector<8x128xf32>
    %53 = tpu.iota {dimensions = array<i32: 1>} : vector<8x128xi32>
    %c8_i32 = arith.constant 8 : i32
    %54 = vector.broadcast %c8_i32 : i32 to vector<8x128xi32>
    %55 = arith.cmpi slt, %53, %54 : vector<8x128xi32>
    %cst_28 = arith.constant 0.000000e+00 : f32
    %56 = vector.broadcast %cst_28 : f32 to vector<8x128xf32>
    %57 = arith.select %55, %52, %56 : vector<8x128xi1>, vector<8x128xf32>
    %cst_29 = arith.constant dense<0.000000e+00> : vector<8xf32>
    %58 = vector.multi_reduction <add>, %57, %cst_29 [1] : vector<8x128xf32> to vector<8xf32>
    %59 = vector.shape_cast %58 : vector<8xf32> to vector<8x1xf32>
    %60 = math.tanh %23 : vector<8x128xf32>
    %cst_30 = arith.constant 1.000000e+00 : f32
    %61 = vector.broadcast %cst_30 : f32 to vector<8x128xf32>
    %62 = arith.mulf %60, %61 : vector<8x128xf32>
    %cst_31 = arith.constant 0.000000e+00 : f32
    %63 = vector.broadcast %cst_31 : f32 to vector<8x128xf32>
    %64 = arith.addf %62, %63 : vector<8x128xf32>
    %65 = vector.shape_cast %59 : vector<8x1xf32> to vector<8x1xf32>
    %66 = vector.broadcast %65 : vector<8x1xf32> to vector<8x128xf32>
    %67 = tpu.concatenate %37, %64, %66 in 1 : vector<8x128xf32>, vector<8x128xf32>, vector<8x128xf32> -> vector<8x384xf32>
    %c0_32 = arith.constant 0 : index
    %c0_33 = arith.constant 0 : index
    %68 = vector.load %arg9[%c0_32, %c0_33] : memref<8x384xf32, #tpu.memory_space<vmem>>, vector<8x384xf32>
    tpu.vector_store %arg9[%c0_32, %c0_33], %67 {strides = array<i32>} : memref<8x384xf32, #tpu.memory_space<vmem>>, vector<8x384xf32>,
    return
  }
  func.func @transform_0(%arg0: i32) -> (i32, i32) {
    %c0_i32 = arith.constant 0 : i32
    %c0_i32_0 = arith.constant 0 : i32
    return %arg0, %c0_i32 : i32, i32
  }
  func.func @transform_1(%arg0: i32) -> (i32, i32) {
    %c0_i32 = arith.constant 0 : i32
    %c0_i32_0 = arith.constant 0 : i32
    return %arg0, %c0_i32 : i32, i32
  }
  func.func @transform_2(%arg0: i32) -> (i32, i32) {
    %c0_i32 = arith.constant 0 : i32
    %c0_i32_0 = arith.constant 0 : i32
    %c0_i32_1 = arith.constant 0 : i32
    return %c0_i32, %c0_i32_0 : i32, i32
  }
  func.func @transform_3(%arg0: i32) -> (i32, i32) {
    %c0_i32 = arith.constant 0 : i32
    %c0_i32_0 = arith.constant 0 : i32
    %c0_i32_1 = arith.constant 0 : i32
    return %c0_i32, %c0_i32_0 : i32, i32
  }
  func.func @transform_4(%arg0: i32) -> (i32, i32) {
    %c0_i32 = arith.constant 0 : i32
    %c0_i32_0 = arith.constant 0 : i32
    %c0_i32_1 = arith.constant 0 : i32
    return %c0_i32, %c0_i32_0 : i32, i32
  }
  func.func @transform_5(%arg0: i32) -> (i32, i32) {
    %c0_i32 = arith.constant 0 : i32
    %c0_i32_0 = arith.constant 0 : i32
    %c0_i32_1 = arith.constant 0 : i32
    return %c0_i32, %c0_i32_0 : i32, i32
  }
  func.func @transform_6(%arg0: i32) -> (i32, i32) {
    %c0_i32 = arith.constant 0 : i32
    %c0_i32_0 = arith.constant 0 : i32
    %c0_i32_1 = arith.constant 0 : i32
    return %c0_i32, %c0_i32_0 : i32, i32
  }
  func.func @transform_7(%arg0: i32) -> (i32, i32) {
    %c0_i32 = arith.constant 0 : i32
    %c0_i32_0 = arith.constant 0 : i32
    %c0_i32_1 = arith.constant 0 : i32
    return %c0_i32, %c0_i32_0 : i32, i32
  }
  func.func @transform_8(%arg0: i32) -> (i32, i32) {
    %c0_i32 = arith.constant 0 : i32
    %c0_i32_0 = arith.constant 0 : i32
    return %arg0, %c0_i32 : i32, i32
  }
}

</mosaic_0001>

<bundles_post_ra>
// kernel: tpu_custom_call.1
= control target key start
LH: loop header
LB: loop body
LE: loop exit
PB: predicated region body
PF: predicated region fallthrough
CT: control target
= control target key end

     0   :  { %13 = vsyncpa [#allocation3], 0  ;;  %s631_s0 = inlined_call_operand.hbm [shape: f32[8,16], index: 0, kind: input, shape index: {}]   ;;  %s632_s1 = inlined_call_operand.hbm [shape: f32[8,128], index: 1, kind: input, shape index: {}]   ;;  %s633_s2 = inlined_call_operand.hbm [shape: bf16[16,32], index: 2, kind: input, shape index: {}]   ;;  %s634_s3 = inlined_call_operand.vmem [shape: f32[1,32], index: 3, kind: input, shape index: {}]   ;;  %s635_s4 = inlined_call_operand.hbm [shape: bf16[32,32], index: 4, kind: input, shape index: {}]   ;;  %s636_s5 = inlined_call_operand.vmem [shape: f32[1,32], index: 5, kind: input, shape index: {}]   ;;  %s637_s6 = inlined_call_operand.hbm [shape: bf16[32,256], index: 6, kind: input, shape index: {}]   ;;  %s638_s7 = inlined_call_operand.vmem [shape: f32[1,256], index: 7, kind: input, shape index: {}]   ;;  %s639_s8 = inlined_call_operand.hbm [shape: f32[8,384], index: 8, kind: output, shape index: {}]  }
   0x1   :  { %14 = vsyncpa [#allocation6], 0 }
   0x2   :  { %15 = vsyncpa [#allocation9], 0 }
   0x3   :  { %16 = vsyncpa [#allocation4], 0  ;;  %s544_s27 = smov [#allocation5]  }
   0x4   :  { %s33_s28 = sshll.u32 %s544_s27, 4  ;;  %s34_s28 = int_to_ptr.vmem [resolvable:$true] %s33_s28 }
   0x5   :  { %s424_s29 = scalar_lea.vmem %s34_s28, 128  ;;  %p429_p1 = scmp.lt.s32.totalorder %s34_s28, %s34_s28 }
   0x6   :  { %p425_p0 = scmp.ne.s32.totalorder %s34_s28, %s424_s29  ;;  %p430_p2 = scmp.lt.s32.totalorder %s424_s29, %s424_s29 }
   0x8   :  { %p431_p3 = por %p430_p2, %p429_p1 }
   0xa   :  { %p432_p4 = pnand %p431_p3, %p425_p0 }
   0xc   :  { %435 = shalt.err (!%p432_p4)
}
   0xd   :  { %36 = dma.hbm_to_vmem [thread:$0]  %s632_s1, 128, %s34_s28, [#allocation6]  }
   0xe   :  { %s545_s10 = smov [#allocation8]   ;;  %s546_s12 = smov [#allocation2]  }
   0xf   :  { %s56_s11 = sshll.u32 %s545_s10, 4  ;;  %s23_s13 = sshll.u32 %s546_s12, 4  ;;  %s57_s11 = int_to_ptr.vmem [resolvable:$true] %s56_s11  ;;  %s24_s13 = int_to_ptr.vmem [resolvable:$true] %s23_s13 }
  0x10   :  { %s444_s14 = scalar_lea.vmem %s57_s11, 256  ;;  %p449_p6 = scmp.lt.s32.totalorder %s57_s11, %s57_s11 }
  0x11   :  { %p445_p5 = scmp.ne.s32.totalorder %s57_s11, %s444_s14  ;;  %p450_p7 = scmp.lt.s32.totalorder %s444_s14, %s444_s14 }
  0x13   :  { %p451_p8 = por %p450_p7, %p449_p6 }
  0x15   :  { %p452_p9 = pnand %p451_p8, %p445_p5 }
  0x17   :  { %455 = shalt.err (!%p452_p9)
}
  0x18   :  { %s547_s15 = smov 64   ;;  %s548_s16 = smov 4  }
  0x19   :  { %62 = dma.hbm_to_vmem [thread:$0]  %s635_s4, 256, %s57_s11, [#allocation9], %s547_s15, %s547_s15, %s548_s16  }
  0x1a   :  { %s464_s1 = scalar_lea.vmem %s24_s13, 128  ;;  %p469_p11 = scmp.lt.s32.totalorder %s24_s13, %s24_s13 }
  0x1b   :  { %p465_p10 = scmp.ne.s32.totalorder %s24_s13, %s464_s1  ;;  %p470_p12 = scmp.lt.s32.totalorder %s464_s1, %s464_s1 }
  0x1d   :  { %p471_p13 = por %p470_p12, %p469_p11 }
  0x1f   :  { %p472_p0 = pnand %p471_p13, %p465_p10 }
  0x21   :  { %475 = shalt.err (!%p472_p0)
}
  0x22   :  { %26 = dma.hbm_to_vmem [thread:$0]  %s631_s0, 128, %s24_s13, [#allocation3]  }
  0x23   :  { %s549_s21 = smov [#allocation7]   ;;  %s550_s23 = smov [#allocation10]  }
  0x24   :  { %s42_s22 = sshll.u32 %s549_s21, 4  ;;  %s70_s24 = sshll.u32 %s550_s23, 4  ;;  %s43_s22 = int_to_ptr.vmem [resolvable:$true] %s42_s22  ;;  %s71_s24 = int_to_ptr.vmem [resolvable:$true] %s70_s24 }
  0x25   :  { %s484_s25 = scalar_lea.vmem %s43_s22, 128  ;;  %p489_p2 = scmp.lt.s32.totalorder %s43_s22, %s43_s22 }
  0x26   :  { %p485_p1 = scmp.ne.s32.totalorder %s43_s22, %s484_s25  ;;  %p490_p3 = scmp.lt.s32.totalorder %s484_s25, %s484_s25 }
  0x28   :  { %p491_p4 = por %p490_p3, %p489_p2 }
  0x2a   :  { %p492_p5 = pnand %p491_p4, %p485_p1 }
  0x2c   :  { %495 = shalt.err (!%p492_p5)
}
  0x2d   :  { %48 = dma.hbm_to_vmem [thread:$0]  %s633_s2, 128, %s43_s22, [#allocation6], %s547_s15, %s547_s15, %s548_s16  }
  0x2e   :  { %s504_s27 = scalar_lea.vmem %s71_s24, 512  ;;  %p509_p7 = scmp.lt.s32.totalorder %s71_s24, %s71_s24 }
  0x2f   :  { %p505_p6 = scmp.ne.s32.totalorder %s71_s24, %s504_s27  ;;  %p510_p8 = scmp.lt.s32.totalorder %s504_s27, %s504_s27 }
  0x31   :  { %p511_p9 = por %p510_p8, %p509_p7 }
  0x33   :  { %p512_p10 = pnand %p511_p9, %p505_p6 }
  0x35   :  { %515 = shalt.err (!%p512_p10)
}
  0x36   :  { %s551_s0 = smov 128   ;;  %s552_s28 = smov 8  }
  0x37   :  { %76 = dma.hbm_to_vmem [thread:$0]  %s637_s6, 512, %s71_s24, [#allocation9], %s551_s0, %s551_s0, %s552_s28  }
  0x38   :  { %536 = dma.done.wait [#allocation3], 128  }
  0x39   :  { %537 = vsyncadd [#allocation3], 4294967168 }
  0x3a   :  { %538 = dma.done.wait [#allocation6], 256  }
  0x3b   :  { %539 = vsyncadd [#allocation6], 4294967040 }
  0x3c   :  { %540 = dma.done.wait [#allocation9], 768  }
  0x3d   :  { %541 = vsyncadd [#allocation9], 4294966528  ;;  %v553_v0 = vmov 0.0   ;;  %vm554_vm0 = vmmov 0   ;;  %v399_v1 = vld [vmem:[#allocation7] sm:$0xff]   ;;  %v95_v2 = vld [vmem:[#allocation2] sm:$0xff]  ;;  %v233_v27 = vlaneseq }
  0x3e   :  { %372 = vmatprep.subr.bf16.mxu0 %v553_v0  ;;  %374 = vmatprep.mubr.msk.bf16.mxu0 %vm554_vm0, %v553_v0  ;;  %vm112_vm1 = vcmask 130048   ;;  %v96_v3 = vpack.c.bf16 %v95_v2, %v95_v2  ;;  %v400_v4 = vld [vmem:[#allocation8 + $0x8] sm:$0xff]   ;;  %v401_v5 = vld [vmem:[#allocation8] sm:$0xff]   ;;  %vm181_vm2 = vcmask 261120   ;;  %v407_v16 = vld [vmem:[#allocation10 + $0x4] ss:$8 sps:$4 sm:$0xff]  }
  0x3f   :  { %378 = vmatprep.subr.bf16.mxu1 %v553_v0  ;;  %382 = vmatprep.mubr.msk.bf16.mxu1 %vm554_vm0, %v553_v0  ;;  %v402_v6 = vld [vmem:[#allocation10 + $0x10] ss:$8 sps:$4 sm:$0xff]   ;;  %v404_v7 = vld [vmem:[#allocation10 + $0x14] ss:$8 sps:$4 sm:$0xff]   ;;  %v405_v17 = vld [vmem:[#allocation10] ss:$8 sps:$4 sm:$0xff]  }
  0x40   :  { %373 = vmatpush3.bf16.msra.mxu0 %v399_v1  ;;  %379 = vmatpush3.bf16.msra.mxu1 %v400_v4  ;;  %v354_v8 = vld [vmem:[%s634_s3] ss:$0 sm:$0xff]  ;;  %v555_v18 = vmov 0   ;;  %v234_v28 = vshrl.u32 %v233_v27, 7  ;;  %v311_v45 = vld [vmem:[#allocation5] sm:$0xff]  ;;  %v327_v55 = vand.u32 127, %v233_v27 }
  0x41   :  { %380 = vmatprep.subr.bf16.mxu1 %v553_v0  ;;  %278 = vmatprep.subr.bf16.mxu0 %v404_v7  ;;  %v357_v19 = vld [vmem:[%s636_s5] ss:$0 sm:$0xff]  ;;  %v316_v52 = vmul.f32 %v311_v45, %v311_v45  ;;  %s556_s5 = smov [#allocation11]  }
  0x42   :  { %v235_v29 = vsub.s32 0, %v234_v28  ;;  %v231_v30 = vld [vmem:[%s638_s7] sm:$0x3]  ;;  %v239_v31 = vsub.s32 1, %v234_v28  ;;  %vm328_vm3 = vcmp.lt.s32.totalorder %v327_v55, 8  ;;  %s343_s7 = sshll.u32 %s556_s5, 4  ;;  %s344_s7 = int_to_ptr.vmem [resolvable:$true] %s343_s7 }
  0x43   :  { %375 = vmatmul.mubr.msk.bf16.vlgmr.msra.gmra.mxu0 %vm112_vm1, %v96_v3  ;;  %v317_v53 = vmul.f32 -0.5, %v316_v52  ;;  %s516_s12 = scalar_lea.vmem %s344_s7, 384  ;;  %p521_p12 = scmp.lt.s32.totalorder %s344_s7, %s344_s7 }
  0x44   :  { %381 = vmatpush3.bf16.msra.mxu1 %v401_v5  ;;  %279 = vmatpush1.bf16.msra.mxu0 %v402_v6  ;;  %v236_v32 = vrot.slane %v231_v30, %v235_v29  ;;  %v240_v33 = vrot.slane %v231_v30, %v239_v31  ;;  %p517_p11 = scmp.ne.s32.totalorder %s344_s7, %s516_s12  ;;  %p522_p13 = scmp.lt.s32.totalorder %s516_s12, %s516_s12 }
  0x45   :  { %280 = vmatprep.subr.bf16.mxu0 %v407_v16  ;;  %298 = vmatprep.mubr.bf16.mxu0 %v555_v18 }
  0x46   :  { %p523_p0 = por %p522_p13, %p521_p12 }
  0x48   :  { %281 = vmatpush1.bf16.msra.mxu0 %v405_v17  ;;  %p524_p1 = pnand %p523_p0, %p517_p11 }
 0x103   :  { %v150_v9 = vpop.f32.mrf.mxu0 }
 0x104   :  { %v151_v10 = vadd.f32 %v354_v8, %v150_v9 }
 0x105   :  { %v376_v11 = vpop.f32.mrf.mxu0 }
 0x106   :  { %v156_v12 = vmax.f32 %v151_v10, 0.0 }
 0x107   :  { %v153_v13 = vpop.f32.mrf.mxu0 }
 0x108   :  { %v157_v14 = vpack.c.bf16 %v156_v12, %v156_v12 }
 0x109   :  { %v377_v15 = vpop.f32.mrf.mxu0 }
 0x10a   :  { %383 = vmatmul.mubr.msk.bf16.vlgmr.msra.gmra.mxu1 %vm181_vm2, %v157_v14 }
 0x1ca   :  { %v219_v20 = vpop.f32.mrf.mxu1 }
 0x1cb   :  { %v220_v21 = vadd.f32 %v357_v19, %v219_v20 }
 0x1cc   :  { %v384_v22 = vpop.f32.mrf.mxu1 }
 0x1cd   :  { %v225_v23 = vmax.f32 %v220_v21, 0.0 }
 0x1ce   :  { %v222_v24 = vpop.f32.mrf.mxu1 }
 0x1cf   :  { %v226_v25 = vpack.c.bf16 %v225_v23, %v225_v23 }
 0x1d0   :  { %v385_v26 = vpop.f32.mrf.mxu1 }
 0x1d1   :  { %365 = vmatmul.mubr.msk.bf16.vlgmr.msra.gmra.mxu0 %vm181_vm2, %v226_v25 }
 0x291   :  { %v300_v34 = vpop.f32.mrf.mxu0 }
 0x292   :  { %v301_v35 = vadd.f32 %v300_v34, %v236_v32 }
 0x293   :  { %v302_v36 = vpop.f32.mrf.mxu0 }
 0x294   :  { %408 = vtanh.f32 %v301_v35  ;;  %v303_v37 = vadd.f32 %v302_v36, %v240_v33 }
 0x295   :  { %v304_v38 = vpop.f32.mrf.mxu0 }
 0x296   :  { %v307_v39 = vmax.f32 %v303_v37, -20.0 }
 0x297   :  { %v305_v40 = vpop.f32.mrf.mxu0 }
 0x298   :  { %v308_v41 = vmin.f32 %v307_v39, 2.0 }
 0x29a   :  { %v309_v42 = vmul.f32 1.442695, %v308_v41  ;;  %v318_v54 = vsub.f32 %v317_v53, %v308_v41 }
 0x29c   :  { %410 = vpow2.f32 %v309_v42  ;;  %v366_v57 = vadd.f32 -0.9189385, %v318_v54 }
 0x2a1   :  { %v409_v43 = vpop.eup %408 }
 0x2a2   :  { %335 = vst [vmem:[#allocation11 + $0x8] sm:$0xff] %v409_v43 }
 0x2a9   :  { %v411_v44 = vpop.eup %410 }
 0x2aa   :  { %v312_v46 = vmul.f32 %v411_v44, %v311_v45 }
 0x2ac   :  { %v313_v47 = vadd.f32 %v312_v46, %v301_v35 }
 0x2ae   :  { %412 = vtanh.f32 %v313_v47 }
 0x2bb   :  { %v413_v48 = vpop.eup %412 }
 0x2bc   :  { %334 = vst [vmem:[#allocation11] sm:$0xff] %v413_v48  ;;  %v320_v49 = vmul.f32 %v413_v48, %v413_v48 }
 0x2be   :  { %v321_v50 = vsub.f32 1.0, %v320_v49 }
 0x2c0   :  { %v322_v51 = vadd.f32 1e-06, %v321_v50 }
 0x2c2   :  { %414 = vlog2.f32 %v322_v51 }
 0x2cf   :  { %v415_v56 = vpop.eup %414 }
 0x2d0   :  { %v324_v58 = vmul.f32 0.6931472, %v415_v56 }
 0x2d2   :  { %v325_v59 = vsub.f32 %v366_v57, %v324_v58 }
 0x2d4   :  { %v329_v60 = vsel %vm328_vm3, %v325_v59, 0.0 }
 0x2d5   :  { %330 = vadd.xlane.f32.xlu0 %v329_v60 }
 0x35e   :  { %v331_v61 = vpop.xlane.xlu0 %330 }
 0x35f   :  { %336 = vst [vmem:[#allocation11 + $0x10] sm:$0xff] %v331_v61 }
 0x360   :  { %527 = shalt.err (!%p524_p1)
}
 0x361   :  { %346 = dma.vmem_to_hbm [thread:$0]  %s344_s7, 384, %s639_s8, [#allocation4]  }
 0x362   :  { %542 = dma.done.wait [#allocation4], 384  }
 0x363   :  { %543 = vsyncadd [#allocation4], 4294966912 }
 0x364   :  { %350 = vsyncpa [#allocation3], 1 }
 0x365   :  { %351 = vsyncpa [#allocation6], 1 }
 0x366   :  { %352 = vsyncpa [#allocation9], 1 }
 0x367   :  { %353 = vsyncpa [#allocation4], 1 }

</bundles_post_ra>
